<compile_context>
chip_gen: v5e
topology: v5e:2x2
jax: 0.10.0
libtpu: 0.0.40
codegen_flags: <defaults>
</compile_context>

<pallas_src>
import functools

import jax
import jax.numpy as jnp
from jax.experimental import pallas as pl
from jax.experimental.pallas import tpu as pltpu


def _round_up(x, m):
    return ((x + m - 1) // m) * m


def _taylor_rbf_kernel(x1_ref, x2t_ref, ncoeff_ref, a_ref, b_ref, o_ref, *, d):
    # x1_ref:    (tm, d)  VMEM
    # x2t_ref:   (d,  tn) VMEM
    # ncoeff_ref:(d,  d)  SMEM   ncoeff[k, j] = -0.5*(1/l_eval[k]^2 + 1/L[j,k]^2)
    # a_ref:     (d,)     SMEM   a[j] = sigma_eval * sigma[j] / l_eval[j]^4
    # b_ref:     (d,)     SMEM   b[j] = l_eval[j]^2
    # o_ref:     (tm, tn) VMEM
    diff2 = []
    for k in range(d):
        dk = x1_ref[:, k:k + 1] - x2t_ref[k:k + 1, :]   # (tm, tn)
        diff2.append(dk * dk)

    acc = None
    for j in range(d):
        # Exponent already carries the negative sign via ncoeff.
        s = ncoeff_ref[0, j] * diff2[0]
        for k in range(1, d):
            s = s + ncoeff_ref[k, j] * diff2[k]
        term = (a_ref[j] * (b_ref[j] - diff2[j])) * jnp.exp(s)
        acc = term if acc is None else acc + term

    o_ref[...] = acc.astype(o_ref.dtype)


def first_order_taylor_rbf(x1, x2, lengthscales, sigmas, evaluated_dimension,
                           *, tm=256, tn=512):
    """Pallas implementation of FirstOrderTaylorRBF.forward.

    x1: (B1, d) float32
    x2: (B2, d) float32
    lengthscales: (d, d) float32, row j = lengthscale vector of rbf_list[j]
    sigmas: (d,) float32, sigma_k of rbf_list[j]
    """
    x1 = jnp.asarray(x1, jnp.float32)
    x2 = jnp.asarray(x2, jnp.float32)
    lengthscales = jnp.asarray(lengthscales, jnp.float32)
    sigmas = jnp.asarray(sigmas, jnp.float32)

    B1, d = x1.shape
    B2, d2 = x2.shape
    assert d2 == d

    # Tile sizes: rows multiple of 8 (f32 sublane tile), cols multiple of 128
    # (lane width -> unmasked vst).  Shrink tiles for tiny problems.
    tm = min(tm, _round_up(B1, 8))
    tn = min(tn, _round_up(B2, 128))
    B1p = _round_up(B1, tm)
    B2p = _round_up(B2, tn)

    if B1p != B1:
        x1 = jnp.pad(x1, ((0, B1p - B1), (0, 0)))
    if B2p != B2:
        x2 = jnp.pad(x2, ((0, B2p - B2), (0, 0)))

    l_eval = lengthscales[evaluated_dimension]                        # (d,)
    sigma_eval = sigmas[evaluated_dimension]                          # scalar
    # neg_coeff[k, j] = -0.5*(1/l_eval[k]^2 + 1/L[j,k]^2)  (sign pre-folded)
    neg_coeff = (-0.5 * (1.0 / l_eval[None, :] ** 2
                         + 1.0 / lengthscales ** 2)).T.astype(jnp.float32)
    b = (l_eval ** 2).astype(jnp.float32)                             # (d,)
    a = (sigma_eval * sigmas / (b ** 2)).astype(jnp.float32)          # (d,)
    x2t = x2.T                                                        # (d, B2p)

    kernel = functools.partial(_taylor_rbf_kernel, d=d)
    out = pl.pallas_call(
        kernel,
        out_shape=jax.ShapeDtypeStruct((B1p, B2p), jnp.float32),
        grid_spec=pltpu.PrefetchScalarGridSpec(
            num_scalar_prefetch=0,
            grid=(B1p // tm, B2p // tn),
            in_specs=[
                # x1 block index depends only on i -> no re-DMA across j.
                pl.BlockSpec((tm, d), lambda i, j: (i, 0)),
                pl.BlockSpec((d, tn), lambda i, j: (0, j)),
                pl.BlockSpec(memory_space=pltpu.MemorySpace.SMEM),
                pl.BlockSpec(memory_space=pltpu.MemorySpace.SMEM),
                pl.BlockSpec(memory_space=pltpu.MemorySpace.SMEM),
            ],
            out_specs=pl.BlockSpec((tm, tn), lambda i, j: (i, j)),
        ),
        compiler_params=pltpu.CompilerParams(
            dimension_semantics=("parallel", "parallel"),
            vmem_limit_bytes=48 * 1024 * 1024,   # safe on v5e/v6e (128 MiB) and v7x (64 MiB)
        ),
    )(x1, x2t, neg_coeff, a, b)

    return out[:B1, :B2]


def reference(x1, x2, lengthscales, sigmas, ed):
    """Direct transcription of the PyTorch forward (pure JAX) for validation."""
    B1, d = x1.shape
    B2 = x2.shape[0]
    x1_k = x1.reshape(B1, 1, 1, d)
    x2_k = x2.reshape(1, B2, 1, d)
    l_i = lengthscales[ed].reshape(1, 1, 1, d)
    l_j = lengthscales.reshape(1, 1, d, d)
    inner = 0.5 * ((x1_k - x2_k) ** 2 * (1.0 / l_i ** 2 + 1.0 / l_j ** 2))
    exp_sum = jnp.exp(-jnp.sum(inner, axis=3))
    sigma_j = sigmas.reshape(1, 1, d)
    l_ij2 = lengthscales[ed].reshape(1, 1, d) ** 2
    x1_j = x1.reshape(B1, 1, d)
    x2_j = x2.reshape(1, B2, d)
    outer = sigma_j / l_ij2 ** 2 * (l_ij2 - (x1_j - x2_j) ** 2) * exp_sum
    return sigmas[ed] * jnp.sum(outer, axis=2)


if __name__ == "__main__":
    key = jax.random.PRNGKey(0)

    # --- Primary small test consistent with the module: batch=16, d=4 -------
    d = 4
    B1, B2 = 16, 16
    ed = 1
    k1, k2 = jax.random.split(key)
    x1 = jax.random.normal(k1, (B1, d), dtype=jnp.float32)
    x2 = jax.random.normal(k2, (B2, d), dtype=jnp.float32)
    lengthscales = 0.5 + 0.1 * jnp.arange(d * d, dtype=jnp.float32).reshape(d, d)
    sigmas = 1.0 + 0.1 * jnp.arange(d, dtype=jnp.float32)

    out = jax.block_until_ready(
        first_order_taylor_rbf(x1, x2, lengthscales, sigmas, ed))
    ref = reference(x1, x2, lengthscales, sigmas, ed)
    assert out.shape == (B1, B2)
    assert jnp.allclose(out, ref, atol=1e-5, rtol=1e-5)

    # --- Secondary test: non-tile-multiple shapes exercise padding + 2-D grid
    d = 3
    B1, B2 = 260, 200
    ed = 2
    k3, k4 = jax.random.split(k2)
    x1 = jax.random.normal(k3, (B1, d), dtype=jnp.float32)
    x2 = jax.random.normal(k4, (B2, d), dtype=jnp.float32)
    lengthscales = 0.4 + 0.05 * jnp.arange(d * d, dtype=jnp.float32).reshape(d, d)
    sigmas = 0.8 + 0.2 * jnp.arange(d, dtype=jnp.float32)

    out = jax.block_until_ready(
        first_order_taylor_rbf(x1, x2, lengthscales, sigmas, ed))
    ref = reference(x1, x2, lengthscales, sigmas, ed)
    assert out.shape == (B1, B2)
    assert jnp.allclose(out, ref, atol=1e-4, rtol=1e-4)

    print("KERNEL_OK")
</pallas_src>

<mosaic_0001>
module attributes {stable_mosaic.version = 11 : i64} {
  func.func @_taylor_rbf_kernel(%arg0: i32, %arg1: i32, %arg2: memref<16x4xf32, #tpu.memory_space<vmem>>, %arg3: memref<4x128xf32, #tpu.memory_space<vmem>>, %arg4: memref<4x4xf32, #tpu.memory_space<smem>>, %arg5: memref<4xf32, #tpu.memory_space<smem>>, %arg6: memref<4xf32, #tpu.memory_space<smem>>, %arg7: memref<16x128xf32, #tpu.memory_space<vmem>>) attributes {dimension_semantics = [#tpu.dimension_semantics<parallel>, #tpu.dimension_semantics<parallel>], iteration_bounds = array<i64: 1, 1>, scalar_prefetch = 0 : i64, scratch_operands = 0 : i64, tpu.core_type = #tpu.core_type<tc>, window_params = [{transform_indices = @transform_0, window_bounds = array<i64: 16, 4>}, {transform_indices = @transform_1, window_bounds = array<i64: 4, 128>}, {transform_indices = @transform_2, window_bounds = array<i64: 4, 4>}, {transform_indices = @transform_3, window_bounds = array<i64: 4>}, {transform_indices = @transform_4, window_bounds = array<i64: 4>}, {transform_indices = @transform_5, window_bounds = array<i64: 16, 128>}]} {
    %c0 = arith.constant 0 : index
    %c0_0 = arith.constant 0 : index
    %0 = vector.load %arg2[%c0, %c0_0] : memref<16x4xf32, #tpu.memory_space<vmem>>, vector<16x1xf32>
    %c0_1 = arith.constant 0 : index
    %c0_2 = arith.constant 0 : index
    %1 = vector.load %arg3[%c0_1, %c0_2] : memref<4x128xf32, #tpu.memory_space<vmem>>, vector<1x128xf32>
    %2 = vector.broadcast %0 : vector<16x1xf32> to vector<16x128xf32>
    %3 = vector.broadcast %1 : vector<1x128xf32> to vector<16x128xf32>
    %4 = arith.subf %2, %3 : vector<16x128xf32>
    %5 = arith.mulf %4, %4 : vector<16x128xf32>
    %c0_3 = arith.constant 0 : index
    %c1 = arith.constant 1 : index
    %6 = vector.load %arg2[%c0_3, %c1] : memref<16x4xf32, #tpu.memory_space<vmem>>, vector<16x1xf32>
    %c1_4 = arith.constant 1 : index
    %c0_5 = arith.constant 0 : index
    %7 = vector.load %arg3[%c1_4, %c0_5] : memref<4x128xf32, #tpu.memory_space<vmem>>, vector<1x128xf32>
    %8 = vector.broadcast %6 : vector<16x1xf32> to vector<16x128xf32>
    %9 = vector.broadcast %7 : vector<1x128xf32> to vector<16x128xf32>
    %10 = arith.subf %8, %9 : vector<16x128xf32>
    %11 = arith.mulf %10, %10 : vector<16x128xf32>
    %c0_6 = arith.constant 0 : index
    %c2 = arith.constant 2 : index
    %12 = vector.load %arg2[%c0_6, %c2] : memref<16x4xf32, #tpu.memory_space<vmem>>, vector<16x1xf32>
    %c2_7 = arith.constant 2 : index
    %c0_8 = arith.constant 0 : index
    %13 = vector.load %arg3[%c2_7, %c0_8] : memref<4x128xf32, #tpu.memory_space<vmem>>, vector<1x128xf32>
    %14 = vector.broadcast %12 : vector<16x1xf32> to vector<16x128xf32>
    %15 = vector.broadcast %13 : vector<1x128xf32> to vector<16x128xf32>
    %16 = arith.subf %14, %15 : vector<16x128xf32>
    %17 = arith.mulf %16, %16 : vector<16x128xf32>
    %c0_9 = arith.constant 0 : index
    %c3 = arith.constant 3 : index
    %18 = vector.load %arg2[%c0_9, %c3] : memref<16x4xf32, #tpu.memory_space<vmem>>, vector<16x1xf32>
    %c3_10 = arith.constant 3 : index
    %c0_11 = arith.constant 0 : index
    %19 = vector.load %arg3[%c3_10, %c0_11] : memref<4x128xf32, #tpu.memory_space<vmem>>, vector<1x128xf32>
    %20 = vector.broadcast %18 : vector<16x1xf32> to vector<16x128xf32>
    %21 = vector.broadcast %19 : vector<1x128xf32> to vector<16x128xf32>
    %22 = arith.subf %20, %21 : vector<16x128xf32>
    %23 = arith.mulf %22, %22 : vector<16x128xf32>
    %c0_12 = arith.constant 0 : index
    %c0_13 = arith.constant 0 : index
    %24 = memref.load %arg4[%c0_12, %c0_13] : memref<4x4xf32, #tpu.memory_space<smem>>
    %25 = vector.broadcast %24 : f32 to vector<16x128xf32>
    %26 = arith.mulf %25, %5 : vector<16x128xf32>
    %c1_14 = arith.constant 1 : index
    %c0_15 = arith.constant 0 : index
    %27 = memref.load %arg4[%c1_14, %c0_15] : memref<4x4xf32, #tpu.memory_space<smem>>
    %28 = vector.broadcast %27 : f32 to vector<16x128xf32>
    %29 = arith.mulf %28, %11 : vector<16x128xf32>
    %30 = arith.addf %26, %29 : vector<16x128xf32>
    %c2_16 = arith.constant 2 : index
    %c0_17 = arith.constant 0 : index
    %31 = memref.load %arg4[%c2_16, %c0_17] : memref<4x4xf32, #tpu.memory_space<smem>>
    %32 = vector.broadcast %31 : f32 to vector<16x128xf32>
    %33 = arith.mulf %32, %17 : vector<16x128xf32>
    %34 = arith.addf %30, %33 : vector<16x128xf32>
    %c3_18 = arith.constant 3 : index
    %c0_19 = arith.constant 0 : index
    %35 = memref.load %arg4[%c3_18, %c0_19] : memref<4x4xf32, #tpu.memory_space<smem>>
    %36 = vector.broadcast %35 : f32 to vector<16x128xf32>
    %37 = arith.mulf %36, %23 : vector<16x128xf32>
    %38 = arith.addf %34, %37 : vector<16x128xf32>
    %c0_20 = arith.constant 0 : index
    %39 = memref.load %arg5[%c0_20] : memref<4xf32, #tpu.memory_space<smem>>
    %c0_21 = arith.constant 0 : index
    %40 = memref.load %arg6[%c0_21] : memref<4xf32, #tpu.memory_space<smem>>
    %41 = vector.broadcast %40 : f32 to vector<16x128xf32>
    %42 = arith.subf %41, %5 : vector<16x128xf32>
    %43 = vector.broadcast %39 : f32 to vector<16x128xf32>
    %44 = arith.mulf %43, %42 : vector<16x128xf32>
    %45 = math.exp %38 : vector<16x128xf32>
    %46 = arith.mulf %44, %45 : vector<16x128xf32>
    %c0_22 = arith.constant 0 : index
    %c1_23 = arith.constant 1 : index
    %47 = memref.load %arg4[%c0_22, %c1_23] : memref<4x4xf32, #tpu.memory_space<smem>>
    %48 = vector.broadcast %47 : f32 to vector<16x128xf32>
    %49 = arith.mulf %48, %5 : vector<16x128xf32>
    %c1_24 = arith.constant 1 : index
    %c1_25 = arith.constant 1 : index
    %50 = memref.load %arg4[%c1_24, %c1_25] : memref<4x4xf32, #tpu.memory_space<smem>>
    %51 = vector.broadcast %50 : f32 to vector<16x128xf32>
    %52 = arith.mulf %51, %11 : vector<16x128xf32>
    %53 = arith.addf %49, %52 : vector<16x128xf32>
    %c2_26 = arith.constant 2 : index
    %c1_27 = arith.constant 1 : index
    %54 = memref.load %arg4[%c2_26, %c1_27] : memref<4x4xf32, #tpu.memory_space<smem>>
    %55 = vector.broadcast %54 : f32 to vector<16x128xf32>
    %56 = arith.mulf %55, %17 : vector<16x128xf32>
    %57 = arith.addf %53, %56 : vector<16x128xf32>
    %c3_28 = arith.constant 3 : index
    %c1_29 = arith.constant 1 : index
    %58 = memref.load %arg4[%c3_28, %c1_29] : memref<4x4xf32, #tpu.memory_space<smem>>
    %59 = vector.broadcast %58 : f32 to vector<16x128xf32>
    %60 = arith.mulf %59, %23 : vector<16x128xf32>
    %61 = arith.addf %57, %60 : vector<16x128xf32>
    %c1_30 = arith.constant 1 : index
    %62 = memref.load %arg5[%c1_30] : memref<4xf32, #tpu.memory_space<smem>>
    %c1_31 = arith.constant 1 : index
    %63 = memref.load %arg6[%c1_31] : memref<4xf32, #tpu.memory_space<smem>>
    %64 = vector.broadcast %63 : f32 to vector<16x128xf32>
    %65 = arith.subf %64, %11 : vector<16x128xf32>
    %66 = vector.broadcast %62 : f32 to vector<16x128xf32>
    %67 = arith.mulf %66, %65 : vector<16x128xf32>
    %68 = math.exp %61 : vector<16x128xf32>
    %69 = arith.mulf %67, %68 : vector<16x128xf32>
    %70 = arith.addf %46, %69 : vector<16x128xf32>
    %c0_32 = arith.constant 0 : index
    %c2_33 = arith.constant 2 : index
    %71 = memref.load %arg4[%c0_32, %c2_33] : memref<4x4xf32, #tpu.memory_space<smem>>
    %72 = vector.broadcast %71 : f32 to vector<16x128xf32>
    %73 = arith.mulf %72, %5 : vector<16x128xf32>
    %c1_34 = arith.constant 1 : index
    %c2_35 = arith.constant 2 : index
    %74 = memref.load %arg4[%c1_34, %c2_35] : memref<4x4xf32, #tpu.memory_space<smem>>
    %75 = vector.broadcast %74 : f32 to vector<16x128xf32>
    %76 = arith.mulf %75, %11 : vector<16x128xf32>
    %77 = arith.addf %73, %76 : vector<16x128xf32>
    %c2_36 = arith.constant 2 : index
    %c2_37 = arith.constant 2 : index
    %78 = memref.load %arg4[%c2_36, %c2_37] : memref<4x4xf32, #tpu.memory_space<smem>>
    %79 = vector.broadcast %78 : f32 to vector<16x128xf32>
    %80 = arith.mulf %79, %17 : vector<16x128xf32>
    %81 = arith.addf %77, %80 : vector<16x128xf32>
    %c3_38 = arith.constant 3 : index
    %c2_39 = arith.constant 2 : index
    %82 = memref.load %arg4[%c3_38, %c2_39] : memref<4x4xf32, #tpu.memory_space<smem>>
    %83 = vector.broadcast %82 : f32 to vector<16x128xf32>
    %84 = arith.mulf %83, %23 : vector<16x128xf32>
    %85 = arith.addf %81, %84 : vector<16x128xf32>
    %c2_40 = arith.constant 2 : index
    %86 = memref.load %arg5[%c2_40] : memref<4xf32, #tpu.memory_space<smem>>
    %c2_41 = arith.constant 2 : index
    %87 = memref.load %arg6[%c2_41] : memref<4xf32, #tpu.memory_space<smem>>
    %88 = vector.broadcast %87 : f32 to vector<16x128xf32>
    %89 = arith.subf %88, %17 : vector<16x128xf32>
    %90 = vector.broadcast %86 : f32 to vector<16x128xf32>
    %91 = arith.mulf %90, %89 : vector<16x128xf32>
    %92 = math.exp %85 : vector<16x128xf32>
    %93 = arith.mulf %91, %92 : vector<16x128xf32>
    %94 = arith.addf %70, %93 : vector<16x128xf32>
    %c0_42 = arith.constant 0 : index
    %c3_43 = arith.constant 3 : index
    %95 = memref.load %arg4[%c0_42, %c3_43] : memref<4x4xf32, #tpu.memory_space<smem>>
    %96 = vector.broadcast %95 : f32 to vector<16x128xf32>
    %97 = arith.mulf %96, %5 : vector<16x128xf32>
    %c1_44 = arith.constant 1 : index
    %c3_45 = arith.constant 3 : index
    %98 = memref.load %arg4[%c1_44, %c3_45] : memref<4x4xf32, #tpu.memory_space<smem>>
    %99 = vector.broadcast %98 : f32 to vector<16x128xf32>
    %100 = arith.mulf %99, %11 : vector<16x128xf32>
    %101 = arith.addf %97, %100 : vector<16x128xf32>
    %c2_46 = arith.constant 2 : index
    %c3_47 = arith.constant 3 : index
    %102 = memref.load %arg4[%c2_46, %c3_47] : memref<4x4xf32, #tpu.memory_space<smem>>
    %103 = vector.broadcast %102 : f32 to vector<16x128xf32>
    %104 = arith.mulf %103, %17 : vector<16x128xf32>
    %105 = arith.addf %101, %104 : vector<16x128xf32>
    %c3_48 = arith.constant 3 : index
    %c3_49 = arith.constant 3 : index
    %106 = memref.load %arg4[%c3_48, %c3_49] : memref<4x4xf32, #tpu.memory_space<smem>>
    %107 = vector.broadcast %106 : f32 to vector<16x128xf32>
    %108 = arith.mulf %107, %23 : vector<16x128xf32>
    %109 = arith.addf %105, %108 : vector<16x128xf32>
    %c3_50 = arith.constant 3 : index
    %110 = memref.load %arg5[%c3_50] : memref<4xf32, #tpu.memory_space<smem>>
    %c3_51 = arith.constant 3 : index
    %111 = memref.load %arg6[%c3_51] : memref<4xf32, #tpu.memory_space<smem>>
    %112 = vector.broadcast %111 : f32 to vector<16x128xf32>
    %113 = arith.subf %112, %23 : vector<16x128xf32>
    %114 = vector.broadcast %110 : f32 to vector<16x128xf32>
    %115 = arith.mulf %114, %113 : vector<16x128xf32>
    %116 = math.exp %109 : vector<16x128xf32>
    %117 = arith.mulf %115, %116 : vector<16x128xf32>
    %118 = arith.addf %94, %117 : vector<16x128xf32>
    %c0_52 = arith.constant 0 : index
    %c0_53 = arith.constant 0 : index
    %119 = vector.load %arg7[%c0_52, %c0_53] : memref<16x128xf32, #tpu.memory_space<vmem>>, vector<16x128xf32>
    tpu.vector_store %arg7[%c0_52, %c0_53], %118 {strides = array<i32>} : memref<16x128xf32, #tpu.memory_space<vmem>>, vector<16x128xf32>,
    return
  }
  func.func @transform_0(%arg0: i32, %arg1: i32) -> (i32, i32) {
    %c0_i32 = arith.constant 0 : i32
    %c0_i32_0 = arith.constant 0 : i32
    return %arg0, %c0_i32 : i32, i32
  }
  func.func @transform_1(%arg0: i32, %arg1: i32) -> (i32, i32) {
    %c0_i32 = arith.constant 0 : i32
    %c0_i32_0 = arith.constant 0 : i32
    return %c0_i32, %arg1 : i32, i32
  }
  func.func @transform_2(%arg0: i32, %arg1: i32) -> (i32, i32) {
    %c0_i32 = arith.constant 0 : i32
    %c0_i32_0 = arith.constant 0 : i32
    %c0_i32_1 = arith.constant 0 : i32
    return %c0_i32, %c0_i32_0 : i32, i32
  }
  func.func @transform_3(%arg0: i32, %arg1: i32) -> i32 {
    %c0_i32 = arith.constant 0 : i32
    %c0_i32_0 = arith.constant 0 : i32
    return %c0_i32 : i32
  }
  func.func @transform_4(%arg0: i32, %arg1: i32) -> i32 {
    %c0_i32 = arith.constant 0 : i32
    %c0_i32_0 = arith.constant 0 : i32
    return %c0_i32 : i32
  }
  func.func @transform_5(%arg0: i32, %arg1: i32) -> (i32, i32) {
    %c0_i32 = arith.constant 0 : i32
    return %arg0, %arg1 : i32, i32
  }
}

</mosaic_0001>

<bundles_post_ra>
// kernel: tpu_custom_call.1
= control target key start
LH: loop header
LB: loop body
LE: loop exit
PB: predicated region body
PF: predicated region fallthrough
CT: control target
= control target key end

     0   :  { %10 = vsyncpa [#allocation4], 0  ;;  %s613_s0 = inlined_call_operand.vmem [shape: f32[16,4], index: 0, kind: input, shape index: {}]   ;;  %s614_s1 = inlined_call_operand.vmem [shape: f32[4,128], index: 1, kind: input, shape index: {}]   ;;  %s615_s2 = inlined_call_operand.vmem [shape: f32[4,4], index: 2, kind: input, shape index: {}]   ;;  %s616_s3 = inlined_call_operand.vmem [shape: f32[4], index: 3, kind: input, shape index: {}]   ;;  %s617_s4 = inlined_call_operand.vmem [shape: f32[4], index: 4, kind: input, shape index: {}]   ;;  %s618_s5 = inlined_call_operand.hbm [shape: f32[16,128], index: 5, kind: output, shape index: {}]  }
   0x1   :  { %11 = vsyncpa [#allocation6], 0  ;;  %s31_s20 = sshll.u32 %s616_s3, 4  ;;  %s32_s20 = int_to_ptr.vmem [resolvable:$true] %s31_s20 }
   0x2   :  { %12 = vsyncpa [#allocation3], 0  ;;  %s22_s23 = sshll.u32 %s615_s2, 4  ;;  %s411_s24 = smov [#allocation5]   ;;  %s23_s23 = int_to_ptr.vmem [resolvable:$true] %s22_s23 }
   0x3   :  { %34 = dma.vmem_to_smem %s32_s20, 16, %s411_s24, [#allocation6]  }
   0x4   :  { %s412_s25 = smov [#allocation2]   ;;  %s40_s28 = sshll.u32 %s617_s4, 4  ;;  %s41_s28 = int_to_ptr.vmem [resolvable:$true] %s40_s28 }
   0x5   :  { %25 = dma.vmem_to_smem %s23_s23, 64, %s412_s25, [#allocation4]  }
   0x6   :  { %s413_s29 = smov [#allocation7]  }
   0x7   :  { %43 = dma.vmem_to_smem %s41_s28, 16, %s413_s29, [#allocation6]  }
   0x8   :  { %405 = dma.done.wait [#allocation4], 64  }
   0x9   :  { %406 = vsyncadd [#allocation4], 4294967232 }
   0xa   :  { %407 = dma.done.wait [#allocation6], 32  }
   0xb   :  { %408 = vsyncadd [#allocation6], 4294967264 }
   0xc   :  { %56 = sfence }
   0xd   :  { %v57_v0 = vld [vmem:[%s613_s0] sm:$0xff]  ;;  %v414_v1 = vmov 1   ;;  %v415_v2 = vmov 0   ;;  %v416_v3 = vmov 2   ;;  %v58_v4 = vld [vmem:[%s613_s0 + $0x8] sm:$0xff]  ;;  %v417_v5 = vmov 3  }
   0xe   :  { %321 = vset.pattern.permute.xlu1 %v414_v1  ;;  %320 = vset.pattern.permute.xlu0 %v415_v2  ;;  %s466_s6 = sld [smem:[#allocation2 + $0x100]]  ;;  %v325_v7 = vld [vmem:[%s614_s1 + $0x2] ss:$0 sm:$0xff]  ;;  %v326_v8 = vld [vmem:[%s614_s1 + $0x1] ss:$0 sm:$0xff]  ;;  %s419_s12 = smov 128  }
   0xf   :  { %77 = vperm.xlu1 %321, %v57_v0   ;;  %62 = vperm.xlu0 %320, %v57_v0   ;;  %s468_s7 = sld [smem:[#allocation2 + $0x101]]  ;;  %v327_v10 = vld [vmem:[%s614_s1] ss:$0 sm:$0xff]  ;;  %v328_v57 = vld [vmem:[%s614_s1 + $0x3] ss:$0 sm:$0xff]  ;;  %s420_s13 = smov 8  }
  0x10   :  { %322 = vset.pattern.permute.xlu2 %v416_v3  ;;  %s470_s8 = sld [smem:[#allocation2 + $0x102]] }
  0x11   :  { %91 = vperm.xlu2 %322, %v57_v0   ;;  %s472_s9 = sld [smem:[#allocation2 + $0x103]] }
  0x12   :  { %s474_s10 = sld [smem:[#allocation2 + $0x80]] }
  0x13   :  { %s476_s0 = sld [smem:[#allocation2 + $0x81]] }
  0x14   :  { %s478_s11 = sld [smem:[#allocation2 + $0x82]]  ;;  %v128_v16 = vstv %s466_s6 }
  0x15   :  { %s483_s14 = sld [smem:[#allocation2 + $0x83]]  ;;  %v164_v17 = vstv %s468_s7 }
  0x16   :  { %s485_s15 = sld [smem:[#allocation2]]  ;;  %v202_v19 = vstv %s470_s8  ;;  %s418_s8 = smov [#allocation8]  }
  0x17   :  { %81 = vperm.xlu1 %321, %v58_v4   ;;  %67 = vperm.xlu0 %320, %v58_v4   ;;  %s487_s16 = sld [smem:[#allocation2 + $0x1]]  ;;  %v240_v20 = vstv %s472_s9  ;;  %s273_s9 = sshll.u32 %s418_s8, 4  ;;  %s274_s9 = int_to_ptr.vmem [resolvable:$true] %s273_s9 }
  0x18   :  { %s495_s21 = sld [smem:[#allocation2 + $0x2]]  ;;  %v122_v21 = vstv %s474_s10 }
  0x19   :  { %95 = vperm.xlu2 %322, %v58_v4   ;;  %s497_s22 = sld [smem:[#allocation2 + $0x3]]  ;;  %v158_v22 = vstv %s476_s0 }
  0x1a   :  { %s499_s23 = sld [smem:[#allocation2 + $0x180]]  ;;  %v196_v23 = vstv %s478_s11  ;;  %s275_s11 = sshll.u32 %s618_s5, 4  ;;  %s276_s11 = int_to_ptr.hbm [resolvable:$true] %s275_s11 }
  0x1b   :  { %s501_s24 = sld [smem:[#allocation2 + $0x181]]  ;;  %v234_v24 = vstv %s483_s14 }
  0x1c   :  { %v118_v25 = vstv %s485_s15  ;;  %s514_s25 = sld [smem:[#allocation2 + $0x182]] }
  0x1d   :  { %v154_v28 = vstv %s487_s16  ;;  %s522_s26 = sld [smem:[#allocation2 + $0x183]] }
  0x1e   :  { %v192_v29 = vstv %s495_s21  ;;  %s564_s1 = sld [smem:[#allocation7 + $0x2]] }
  0x1f   :  { %324 = vset.pattern.permute.xlu1 %v417_v5  ;;  %323 = vset.pattern.permute.xlu0 %v417_v5  ;;  %v230_v34 = vstv %s497_s22  ;;  %s568_s29 = sld [smem:[#allocation5 + $0x1]] }
  0x20   :  { %109 = vperm.xlu1 %324, %v58_v4   ;;  %105 = vperm.xlu0 %323, %v57_v0   ;;  %v134_v40 = vstv %s499_s23  ;;  %s576_s3 = sld [smem:[#allocation7]] }
  0x21   :  { %v170_v44 = vstv %s501_s24  ;;  %s580_s30 = sld [smem:[#allocation7 + $0x1]] }
  0x22   :  { %v208_v0 = vstv %s514_s25  ;;  %s582_s2 = sld [smem:[#allocation5]] }
  0x23   :  { %v246_v1 = vstv %s522_s26  ;;  %s584_s4 = sld [smem:[#allocation7 + $0x3]] }
  0x24   :  { %s589_s6 = sld [smem:[#allocation5 + $0x2]] }
  0x25   :  { %s593_s7 = sld [smem:[#allocation5 + $0x3]] }
  0x6b   :  { %v92_v6 = vpop.permute.xlu2 %91 }
  0x6c   :  { %v99_v12 = vsub.f32 %v92_v6, %v325_v7 }
  0x6e   :  { %v505_v18 = vmul.f32 %v99_v12, %v99_v12 }
  0x70   :  { %v129_v33 = vmul.f32 %v128_v16, %v505_v18  ;;  %v165_v37 = vmul.f32 %v164_v17, %v505_v18  ;;  %v203_v38 = vmul.f32 %v202_v19, %v505_v18  ;;  %v533_v39 = vmul.f32 %v240_v20, %v505_v18 }
  0x73   :  { %v96_v15 = vpop.permute.xlu2 %95 }
  0x74   :  { %v100_v26 = vsub.f32 %v96_v15, %v325_v7 }
  0x76   :  { %v536_v41 = vmul.f32 %v100_v26, %v100_v26 }
  0x78   :  { %v242_v15 = vmul.f32 %v240_v20, %v536_v41 }
  0x81   :  { %v78_v9 = vpop.permute.xlu1 %77  ;;  %v63_v11 = vpop.permute.xlu0 %62 }
  0x82   :  { %v85_v13 = vsub.f32 %v78_v9, %v326_v8  ;;  %v71_v14 = vsub.f32 %v63_v11, %v327_v10  ;;  %v166_v9 = vmul.f32 %v164_v17, %v536_v41 }
  0x84   :  { %v516_v27 = vmul.f32 %v85_v13, %v85_v13  ;;  %v520_v30 = vmul.f32 %v71_v14, %v71_v14  ;;  %v204_v14 = vmul.f32 %v202_v19, %v536_v41 }
  0x86   :  { %v123_v45 = vmul.f32 %v122_v21, %v516_v27  ;;  %v159_v46 = vmul.f32 %v158_v22, %v516_v27  ;;  %v119_v47 = vmul.f32 %v118_v25, %v520_v30  ;;  %v155_v48 = vmul.f32 %v154_v28, %v520_v30 }
  0x87   :  { %v197_v49 = vmul.f32 %v196_v23, %v516_v27  ;;  %v235_v53 = vmul.f32 %v234_v24, %v516_v27  ;;  %v193_v58 = vmul.f32 %v192_v29, %v520_v30  ;;  %v231_v59 = vmul.f32 %v230_v34, %v520_v30 }
  0x88   :  { %v125_v62 = vadd.f32 %v123_v45, %v119_v47  ;;  %v161_v63 = vadd.f32 %v159_v46, %v155_v48 }
  0x89   :  { %v82_v31 = vpop.permute.xlu1 %81  ;;  %v68_v32 = vpop.permute.xlu0 %67  ;;  %v199_v12 = vadd.f32 %v197_v49, %v193_v58  ;;  %v237_v13 = vadd.f32 %v235_v53, %v231_v59  ;;  %v215_v53 = vstv %s564_s1 }
  0x8a   :  { %v86_v35 = vsub.f32 %v82_v31, %v326_v8  ;;  %v72_v36 = vsub.f32 %v68_v32, %v327_v10  ;;  %v130_v8 = vmul.f32 %v128_v16, %v536_v41 }
  0x8b   :  { %v205_v20 = vadd.f32 %v203_v38, %v199_v12  ;;  %v243_v46 = vadd.f32 %v533_v39, %v237_v13 }
  0x8c   :  { %v538_v42 = vmul.f32 %v86_v35, %v86_v35  ;;  %v540_v43 = vmul.f32 %v72_v36, %v72_v36 }
  0x8e   :  { %v124_v50 = vmul.f32 %v122_v21, %v538_v42  ;;  %v160_v51 = vmul.f32 %v158_v22, %v538_v42  ;;  %v198_v52 = vmul.f32 %v196_v23, %v538_v42  ;;  %v236_v54 = vmul.f32 %v234_v24, %v538_v42 }
  0x8f   :  { %v120_v55 = vmul.f32 %v118_v25, %v540_v43  ;;  %v156_v56 = vmul.f32 %v154_v28, %v540_v43  ;;  %v194_v60 = vmul.f32 %v192_v29, %v540_v43  ;;  %v232_v61 = vmul.f32 %v230_v34, %v540_v43 }
  0x90   :  { %v131_v22 = vadd.f32 %v129_v33, %v125_v62  ;;  %v167_v23 = vadd.f32 %v165_v37, %v161_v63  ;;  %v144_v63 = vstv %s582_s2 }
  0x91   :  { %v126_v2 = vadd.f32 %v124_v50, %v120_v55  ;;  %v162_v3 = vadd.f32 %v160_v51, %v156_v56  ;;  %v200_v4 = vadd.f32 %v198_v52, %v194_v60  ;;  %v238_v5 = vadd.f32 %v236_v54, %v232_v61 }
  0x92   :  { %v110_v6 = vpop.permute.xlu1 %109  ;;  %v106_v7 = vpop.permute.xlu0 %105  ;;  %v141_v54 = vstv %s576_s3  ;;  %v177_v55 = vstv %s580_s30  ;;  %v180_v60 = vstv %s568_s29  ;;  %v253_v61 = vstv %s584_s4 }
  0x93   :  { %v114_v10 = vsub.f32 %v110_v6, %v328_v57  ;;  %v113_v11 = vsub.f32 %v106_v7, %v328_v57  ;;  %v132_v17 = vadd.f32 %v130_v8, %v126_v2  ;;  %v168_v24 = vadd.f32 %v166_v9, %v162_v3 }
  0x94   :  { %v206_v25 = vadd.f32 %v204_v14, %v200_v4  ;;  %v244_v26 = vadd.f32 %v242_v15, %v238_v5  ;;  %v143_v56 = vsub.f32 %v141_v54, %v540_v43  ;;  %v179_v58 = vsub.f32 %v177_v55, %v538_v42 }
  0x95   :  { %v116_v21 = vmul.f32 %v114_v10, %v114_v10  ;;  %v578_v16 = vmul.f32 %v113_v11, %v113_v11  ;;  %v178_v2 = vsub.f32 %v177_v55, %v516_v27  ;;  %v142_v43 = vsub.f32 %v141_v54, %v520_v30 }
  0x96   :  { %v146_v3 = vmul.f32 %v144_v63, %v143_v56  ;;  %v182_v42 = vmul.f32 %v180_v60, %v179_v58  ;;  %v256_v8 = vstv %s593_s7  ;;  %v216_v10 = vsub.f32 %v215_v53, %v505_v18 }
  0x97   :  { %v136_v28 = vmul.f32 %v134_v40, %v116_v21  ;;  %v172_v19 = vmul.f32 %v170_v44, %v116_v21  ;;  %v210_v29 = vmul.f32 %v208_v0, %v116_v21  ;;  %v248_v31 = vmul.f32 %v246_v1, %v116_v21 }
  0x98   :  { %v135_v32 = vmul.f32 %v134_v40, %v578_v16  ;;  %v171_v33 = vmul.f32 %v170_v44, %v578_v16  ;;  %v209_v34 = vmul.f32 %v208_v0, %v578_v16  ;;  %v247_v38 = vmul.f32 %v246_v1, %v578_v16 }
  0x99   :  { %v138_v35 = vadd.f32 %v136_v28, %v132_v17  ;;  %v174_v36 = vadd.f32 %v172_v19, %v168_v24  ;;  %v212_v37 = vadd.f32 %v210_v29, %v206_v25  ;;  %v250_v45 = vadd.f32 %v248_v31, %v244_v26 }
  0x9a   :  { %v137_v47 = vadd.f32 %v135_v32, %v131_v22  ;;  %v173_v48 = vadd.f32 %v171_v33, %v167_v23  ;;  %v211_v50 = vadd.f32 %v209_v34, %v205_v20  ;;  %v249_v52 = vadd.f32 %v247_v38, %v243_v46 }
  0x9b   :  { %v149_v40 = vmul.f32 1.442695, %v138_v35  ;;  %v185_v49 = vmul.f32 1.442695, %v174_v36  ;;  %v223_v44 = vmul.f32 1.442695, %v212_v37  ;;  %v217_v0 = vsub.f32 %v215_v53, %v536_v41 }
  0x9c   :  { %v261_v51 = vmul.f32 1.442695, %v250_v45  ;;  %v147_v39 = vmul.f32 1.442695, %v137_v47  ;;  %v183_v57 = vmul.f32 1.442695, %v173_v48  ;;  %v218_v1 = vstv %s589_s6 }
  0x9d   :  { %329 = vpow2.f32 %v149_v40  ;;  %v221_v59 = vmul.f32 1.442695, %v211_v50  ;;  %v259_v62 = vmul.f32 1.442695, %v249_v52  ;;  %v255_v5 = vsub.f32 %v253_v61, %v116_v21 }
  0x9e   :  { %331 = vpow2.f32 %v185_v49  ;;  %v220_v11 = vmul.f32 %v218_v1, %v217_v0  ;;  %v181_v13 = vmul.f32 %v180_v60, %v178_v2  ;;  %v145_v27 = vmul.f32 %v144_v63, %v142_v43 }
  0x9f   :  { %333 = vpow2.f32 %v223_v44  ;;  %v254_v30 = vsub.f32 %v253_v61, %v578_v16  ;;  %v258_v23 = vmul.f32 %v256_v8, %v255_v5  ;;  %v219_v26 = vmul.f32 %v218_v1, %v216_v10 }
  0xa0   :  { %335 = vpow2.f32 %v261_v51 }
  0xa1   :  { %337 = vpow2.f32 %v147_v39  ;;  %v257_v20 = vmul.f32 %v256_v8, %v254_v30 }
  0xa2   :  { %339 = vpow2.f32 %v183_v57 }
  0xa3   :  { %v330_v4 = vpop.eup %329  ;;  %341 = vpow2.f32 %v221_v59 }
  0xa4   :  { %v332_v6 = vpop.eup %331  ;;  %343 = vpow2.f32 %v259_v62  ;;  %v152_v7 = vmul.f32 %v330_v4, %v146_v3 }
  0xa5   :  { %v334_v9 = vpop.eup %333  ;;  %v188_v41 = vmul.f32 %v332_v6, %v182_v42 }
  0xa6   :  { %v336_v12 = vpop.eup %335  ;;  %v226_v22 = vmul.f32 %v334_v9, %v220_v11 }
  0xa7   :  { %v338_v14 = vpop.eup %337  ;;  %v190_v15 = vadd.f32 %v188_v41, %v152_v7  ;;  %v264_v19 = vmul.f32 %v336_v12, %v258_v23 }
  0xa8   :  { %v340_v21 = vpop.eup %339  ;;  %v151_v17 = vmul.f32 %v338_v14, %v145_v27 }
  0xa9   :  { %v342_v24 = vpop.eup %341  ;;  %v187_v25 = vmul.f32 %v340_v21, %v181_v13  ;;  %v228_v28 = vadd.f32 %v226_v22, %v190_v15 }
  0xaa   :  { %v344_v29 = vpop.eup %343  ;;  %v225_v31 = vmul.f32 %v342_v24, %v219_v26 }
  0xab   :  { %v189_v18 = vadd.f32 %v187_v25, %v151_v17  ;;  %v266_v32 = vadd.f32 %v264_v19, %v228_v28  ;;  %v263_v33 = vmul.f32 %v344_v29, %v257_v20 }
  0xad   :  { %v227_v16 = vadd.f32 %v225_v31, %v189_v18  ;;  %268 = vst [vmem:[#allocation8 + $0x8] sm:$0xff] %v266_v32 }
  0xaf   :  { %v265_v34 = vadd.f32 %v263_v33, %v227_v16 }
  0xb1   :  { %267 = vst [vmem:[#allocation8] sm:$0xff] %v265_v34 }
  0xb2   :  { %281 = dma.vmem_to_hbm [thread:$0]  %s274_s9, 256, %s276_s11, [#allocation3], %s419_s12, %s419_s12, %s420_s13  }
  0xb3   :  { %409 = dma.done.wait [#allocation3], 256  }
  0xb4   :  { %410 = vsyncadd [#allocation3], 4294967040 }
  0xb5   :  { %286 = vsyncpa [#allocation3], 1 }
  0xb6   :  { %287 = vsyncpa [#allocation4], 1 }
  0xb7   :  { %288 = vsyncpa [#allocation6], 1 }

</bundles_post_ra>
